<compile_context>
chip_gen: v6e
topology: v6e:2x2x1
jax: 0.10.0
libtpu: 0.0.40
codegen_flags: <defaults>
</compile_context>

<pallas_src>
import functools
import math

import jax
import jax.numpy as jnp
from jax import lax
from jax.experimental import pallas as pl
from jax.experimental.pallas import tpu as pltpu

LANES = 128


# ---------------------------------------------------------------------------
# Pallas kernel: implicit-GEMM 3x3 conv + folded-BN shift + ReLU
# ---------------------------------------------------------------------------
def _conv3x3_bn_relu_kernel(x_ref, w_ref, shift_ref, o_ref, acc_ref,
                            *, stride, th, wo, cin):
    # x_ref:     (1, s*s, Hq, Wq, Cin)  bf16 space-to-batch image (resident per n)
    # w_ref:     (3, 3, Cin, COUT_PAD)  bf16 conv weight with BN scale folded in
    # shift_ref: (1, COUT_PAD)          f32 BN shift
    # o_ref:     (TH*Wo, COUT_PAD)      f32 output rows of this (n, row-tile)
    # acc_ref:   (TH*Wo, COUT_PAD)      f32 VMEM accumulator scratch
    i = pl.program_id(1)
    s = stride
    rows = th * wo

    acc_ref[...] = jnp.zeros_like(acc_ref)
    # 9 shifted taps; all reads are unit-stride thanks to the wrapper-side
    # space-to-batch (phase) layout: tap (kh, kw) lives in phase (kh%s, kw%s)
    # at an un-strided offset (kh//s, kw//s).
    for kh in range(3):
        ph, qh = kh % s, kh // s
        for kw in range(3):
            pw, qw = kw % s, kw // s
            tap = x_ref[0, ph * s + pw,
                        pl.ds(i * th + qh, th),
                        pl.ds(qw, wo), :]                       # (TH, Wo, Cin) bf16
            acc_ref[...] += jnp.dot(tap.reshape(rows, cin), w_ref[kh, kw],
                                    preferred_element_type=jnp.float32)

    # f32 epilogue (BN shift + ReLU); BN scale was folded into the weights.
    y = acc_ref[...] + shift_ref[...]
    o_ref[...] = jnp.maximum(y, 0.0).astype(o_ref.dtype)


# ---------------------------------------------------------------------------
# conv_3x3_bn forward (wrapper / glue)
# ---------------------------------------------------------------------------
def conv_3x3_bn_forward(x_nchw, w_oihw, gamma, beta, run_mean, run_var,
                        *, stride, eps=1e-5, target_rows=512):
    N, Cin, H, W = x_nchw.shape
    Cout = w_oihw.shape[0]
    s = int(stride)
    Ho = (H + 2 - 3) // s + 1
    Wo = (W + 2 - 3) // s + 1
    cout_pad = ((Cout + LANES - 1) // LANES) * LANES

    # --- row tiling: TH output rows per grid step, TH*Wo ~ target_rows ------
    th = max(1, min(Ho, target_rows // max(Wo, 1)))
    step = max(1, 8 // math.gcd(Wo, 8))          # keep TH*Wo a multiple of 8
    th = max(step, (th // step) * step)
    ho_pad = ((Ho + th - 1) // th) * th          # pad Ho instead of tm=M fallback
    n_h_tiles = ho_pad // th
    rows = th * Wo

    # --- BatchNorm fold (inference): scale into weights, keep shift ---------
    bn_scale = gamma / jnp.sqrt(run_var + eps)                     # (Cout,)
    bn_shift = beta - run_mean * bn_scale                          # (Cout,)
    w_folded = jnp.transpose(w_oihw, (2, 3, 1, 0)) * bn_scale      # (3,3,Cin,Cout)
    w_pad = jnp.zeros((3, 3, Cin, cout_pad), jnp.float32)
    w_pad = w_pad.at[..., :Cout].set(w_folded).astype(jnp.bfloat16)
    shift_pad = jnp.zeros((1, cout_pad), jnp.float32).at[0, :Cout].set(bn_shift)

    # --- input: NCHW -> padded NHWC -> space-to-batch phases (pure permute) --
    qmax = 2 // s                      # extra shifted rows/cols needed per phase
    hq = ho_pad + qmax
    wq = Wo + qmax
    he, we = s * hq, s * wq

    x_nhwc = jnp.transpose(x_nchw, (0, 2, 3, 1)).astype(jnp.bfloat16)
    x_pad = jnp.pad(x_nhwc, ((0, 0), (1, 1), (1, 1), (0, 0)))      # conv padding
    x_pad = x_pad[:, :he, :we, :]
    x_pad = jnp.pad(x_pad, ((0, 0), (0, he - x_pad.shape[1]),
                            (0, we - x_pad.shape[2]), (0, 0)))
    x_sb = x_pad.reshape(N, hq, s, wq, s, Cin)
    x_sb = jnp.transpose(x_sb, (0, 2, 4, 1, 3, 5)).reshape(N, s * s, hq, wq, Cin)

    # --- pallas call ----------------------------------------------------------
    m_pad = N * ho_pad * Wo
    in_block = s * s * hq * wq * Cin * 2
    out_block = rows * cout_pad * 4
    need = 2 * in_block + 2 * out_block + w_pad.size * 2 + rows * cout_pad * 4 \
        + (1 << 20)
    vmem_limit = int(min(max(2 * need, 32 * 1024 * 1024), 48 * 1024 * 1024))

    kernel = functools.partial(_conv3x3_bn_relu_kernel,
                               stride=s, th=th, wo=Wo, cin=Cin)

    out_mat = pl.pallas_call(
        kernel,
        out_shape=jax.ShapeDtypeStruct((m_pad, cout_pad), jnp.float32),
        grid_spec=pltpu.PrefetchScalarGridSpec(
            num_scalar_prefetch=0,
            grid=(N, n_h_tiles),
            in_specs=[
                # Full space-to-batch image of batch n; constant along the row-
                # tile axis so it is DMA'd once per image (no re-fetch, no im2col).
                pl.BlockSpec((1, s * s, hq, wq, Cin),
                             lambda n, i: (n, 0, 0, 0, 0)),
                pl.BlockSpec((3, 3, Cin, cout_pad),
                             lambda n, i: (0, 0, 0, 0)),
                pl.BlockSpec((1, cout_pad),
                             lambda n, i: (0, 0)),
            ],
            out_specs=pl.BlockSpec((rows, cout_pad),
                                   lambda n, i: (n * n_h_tiles + i, 0)),
            scratch_shapes=[pltpu.VMEM((rows, cout_pad), jnp.float32)],
        ),
        compiler_params=pltpu.CompilerParams(
            dimension_semantics=("parallel", "parallel"),
            vmem_limit_bytes=vmem_limit,
        ),
        cost_estimate=pl.CostEstimate(
            flops=2 * m_pad * 9 * Cin * cout_pad,
            transcendentals=0,
            bytes_accessed=x_sb.size * 2 + w_pad.size * 2
            + shift_pad.size * 4 + m_pad * cout_pad * 4,
        ),
    )(x_sb, w_pad, shift_pad)

    out = out_mat.reshape(N, ho_pad, Wo, cout_pad)[:, :Ho, :, :Cout]
    out_nchw = jnp.transpose(out, (0, 3, 1, 2))

    # The nn.Sequential contains no QuanConv2d / QuanLinear, so mask and
    # temperature are always empty tuples in the reference module.
    return out_nchw, (), ()


# ---------------------------------------------------------------------------
# main
# ---------------------------------------------------------------------------
if __name__ == "__main__":
    key = jax.random.PRNGKey(0)
    k_x, k_w, k_g, k_b, k_m, k_v = jax.random.split(key, 6)

    # small shapes consistent with conv_3x3_bn(inp=4, oup=8, stride=2)
    N, Cin, H, W = 2, 4, 16, 16
    Cout, stride = 8, 2

    x = jax.random.normal(k_x, (N, Cin, H, W), dtype=jnp.float32)
    w = jax.random.normal(k_w, (Cout, Cin, 3, 3), dtype=jnp.float32) * 0.2
    gamma = 1.0 + 0.1 * jax.random.normal(k_g, (Cout,), dtype=jnp.float32)
    beta = 0.1 * jax.random.normal(k_b, (Cout,), dtype=jnp.float32)
    run_mean = 0.1 * jax.random.normal(k_m, (Cout,), dtype=jnp.float32)
    run_var = jnp.abs(jax.random.normal(k_v, (Cout,), dtype=jnp.float32)) + 0.5

    out, mask, temperature = conv_3x3_bn_forward(
        x, w, gamma, beta, run_mean, run_var, stride=stride
    )
    out = jax.block_until_ready(out)

    # -------- references -----------------------------------------------------
    eps = 1e-5
    bn_scale = gamma / jnp.sqrt(run_var + eps)
    bn_shift = beta - run_mean * bn_scale

    # (a) matched precision: same bf16 folded weights / bf16 activations with
    #     f32 accumulation -> tight tolerance, validates the kernel itself.
    w_folded = jnp.transpose(w, (2, 3, 1, 0)) * bn_scale           # (3,3,Cin,Cout)
    w_bf_oihw = jnp.transpose(w_folded.astype(jnp.bfloat16), (3, 2, 0, 1))
    ref_bf = lax.conv_general_dilated(
        x.astype(jnp.bfloat16), w_bf_oihw,
        window_strides=(stride, stride), padding=((1, 1), (1, 1)),
        dimension_numbers=("NCHW", "OIHW", "NCHW"),
        preferred_element_type=jnp.float32)
    ref_bf = jnp.maximum(ref_bf + bn_shift.reshape(1, Cout, 1, 1), 0.0)

    # (b) full f32 reference -> loose tolerance, bounds bf16 quantization.
    ref_f32 = lax.conv_general_dilated(
        x, w, window_strides=(stride, stride), padding=((1, 1), (1, 1)),
        dimension_numbers=("NCHW", "OIHW", "NCHW"), precision="highest")
    ref_f32 = jnp.maximum(ref_f32 * bn_scale.reshape(1, Cout, 1, 1)
                          + bn_shift.reshape(1, Cout, 1, 1), 0.0)

    assert out.shape == (N, Cout, H // stride, W // stride)
    assert mask == () and temperature == ()
    assert jnp.allclose(out, ref_bf, atol=2e-3, rtol=2e-3), \
        float(jnp.max(jnp.abs(out - ref_bf)))
    assert jnp.allclose(out, ref_f32, atol=1e-1, rtol=1e-1), \
        float(jnp.max(jnp.abs(out - ref_f32)))

    # TODO(synk): BatchNorm2d is implemented in inference mode only (folded
    # scale/shift); training-mode running-stat updates are not translated.
    print("KERNEL_OK")
</pallas_src>

<mosaic_0001>
module attributes {stable_mosaic.version = 11 : i64} {
  func.func @_conv3x3_bn_relu_kernel(%arg0: i32, %arg1: i32, %arg2: memref<1x4x9x9x4xbf16, #tpu.memory_space<vmem>>, %arg3: memref<3x3x4x128xbf16, #tpu.memory_space<vmem>>, %arg4: memref<1x128xf32, #tpu.memory_space<vmem>>, %arg5: memref<64x128xf32, #tpu.memory_space<vmem>>, %arg6: memref<64x128xf32, #tpu.memory_space<vmem>>) attributes {dimension_semantics = [#tpu.dimension_semantics<parallel>, #tpu.dimension_semantics<parallel>], iteration_bounds = array<i64: 2, 1>, scalar_prefetch = 0 : i64, scratch_operands = 1 : i64, tpu.core_type = #tpu.core_type<tc>, window_params = [{transform_indices = @transform_0, window_bounds = array<i64: 1, 4, 9, 9, 4>}, {pipeline_mode = #tpu.pipeline_mode<synchronous>, transform_indices = @transform_1, window_bounds = array<i64: 3, 3, 4, 128>}, {pipeline_mode = #tpu.pipeline_mode<synchronous>, transform_indices = @transform_2, window_bounds = array<i64: 1, 128>}, {transform_indices = @transform_3, window_bounds = array<i64: 64, 128>}]} {
    %cst = arith.constant 0.000000e+00 : f32
    %0 = vector.broadcast %cst : f32 to vector<64x128xf32>
    %c0 = arith.constant 0 : index
    %c0_0 = arith.constant 0 : index
    %1 = vector.load %arg6[%c0, %c0_0] : memref<64x128xf32, #tpu.memory_space<vmem>>, vector<64x128xf32>
    tpu.vector_store %arg6[%c0, %c0_0], %0 {strides = array<i32>} : memref<64x128xf32, #tpu.memory_space<vmem>>, vector<64x128xf32>,
    %c8_i32 = arith.constant 8 : i32
    %2 = arith.muli %arg1, %c8_i32 : i32
    %c0_i32 = arith.constant 0 : i32
    %3 = arith.addi %2, %c0_i32 : i32
    %c0_1 = arith.constant 0 : index
    %c0_2 = arith.constant 0 : index
    %4 = arith.index_cast %3 : i32 to index
    %c0_3 = arith.constant 0 : index
    %c0_4 = arith.constant 0 : index
    %5 = vector.load %arg2[%c0_1, %c0_2, %4, %c0_3, %c0_4] : memref<1x4x9x9x4xbf16, #tpu.memory_space<vmem>>, vector<1x1x8x8x4xbf16>
    %6 = vector.shape_cast %5 : vector<1x1x8x8x4xbf16> to vector<8x8x4xbf16>
    %c0_5 = arith.constant 0 : index
    %c0_6 = arith.constant 0 : index
    %7 = vector.load %arg6[%c0_5, %c0_6] : memref<64x128xf32, #tpu.memory_space<vmem>>, vector<64x128xf32>
    %8 = vector.shape_cast %6 : vector<8x8x4xbf16> to vector<64x4xbf16>
    %c0_7 = arith.constant 0 : index
    %c0_8 = arith.constant 0 : index
    %c0_9 = arith.constant 0 : index
    %c0_10 = arith.constant 0 : index
    %9 = vector.load %arg3[%c0_7, %c0_8, %c0_9, %c0_10] : memref<3x3x4x128xbf16, #tpu.memory_space<vmem>>, vector<1x1x4x128xbf16>
    %10 = vector.shape_cast %9 : vector<1x1x4x128xbf16> to vector<4x128xbf16>
    %cst_11 = arith.constant dense<0.000000e+00> : vector<64x128xf32>
    %11 = tpu.matmul %8, %10, %cst_11 {dimension_numbers = #tpu.dot_dimension_numbers<[1], [0], [0], [1], [0, 0, 1, 1], [], []>} : vector<64x4xbf16>, vector<4x128xbf16>, vector<64x128xf32> -> vector<64x128xf32>
    %12 = arith.addf %7, %11 : vector<64x128xf32>
    %c0_12 = arith.constant 0 : index
    %c0_13 = arith.constant 0 : index
    %13 = vector.load %arg6[%c0_12, %c0_13] : memref<64x128xf32, #tpu.memory_space<vmem>>, vector<64x128xf32>
    tpu.vector_store %arg6[%c0_12, %c0_13], %12 {strides = array<i32>} : memref<64x128xf32, #tpu.memory_space<vmem>>, vector<64x128xf32>,
    %c8_i32_14 = arith.constant 8 : i32
    %14 = arith.muli %arg1, %c8_i32_14 : i32
    %c0_i32_15 = arith.constant 0 : i32
    %15 = arith.addi %14, %c0_i32_15 : i32
    %c0_16 = arith.constant 0 : index
    %c1 = arith.constant 1 : index
    %16 = arith.index_cast %15 : i32 to index
    %c0_17 = arith.constant 0 : index
    %c0_18 = arith.constant 0 : index
    %17 = vector.load %arg2[%c0_16, %c1, %16, %c0_17, %c0_18] : memref<1x4x9x9x4xbf16, #tpu.memory_space<vmem>>, vector<1x1x8x8x4xbf16>
    %18 = vector.shape_cast %17 : vector<1x1x8x8x4xbf16> to vector<8x8x4xbf16>
    %c0_19 = arith.constant 0 : index
    %c0_20 = arith.constant 0 : index
    %19 = vector.load %arg6[%c0_19, %c0_20] : memref<64x128xf32, #tpu.memory_space<vmem>>, vector<64x128xf32>
    %20 = vector.shape_cast %18 : vector<8x8x4xbf16> to vector<64x4xbf16>
    %c0_21 = arith.constant 0 : index
    %c1_22 = arith.constant 1 : index
    %c0_23 = arith.constant 0 : index
    %c0_24 = arith.constant 0 : index
    %21 = vector.load %arg3[%c0_21, %c1_22, %c0_23, %c0_24] : memref<3x3x4x128xbf16, #tpu.memory_space<vmem>>, vector<1x1x4x128xbf16>
    %22 = vector.shape_cast %21 : vector<1x1x4x128xbf16> to vector<4x128xbf16>
    %cst_25 = arith.constant dense<0.000000e+00> : vector<64x128xf32>
    %23 = tpu.matmul %20, %22, %cst_25 {dimension_numbers = #tpu.dot_dimension_numbers<[1], [0], [0], [1], [0, 0, 1, 1], [], []>} : vector<64x4xbf16>, vector<4x128xbf16>, vector<64x128xf32> -> vector<64x128xf32>
    %24 = arith.addf %19, %23 : vector<64x128xf32>
    %c0_26 = arith.constant 0 : index
    %c0_27 = arith.constant 0 : index
    %25 = vector.load %arg6[%c0_26, %c0_27] : memref<64x128xf32, #tpu.memory_space<vmem>>, vector<64x128xf32>
    tpu.vector_store %arg6[%c0_26, %c0_27], %24 {strides = array<i32>} : memref<64x128xf32, #tpu.memory_space<vmem>>, vector<64x128xf32>,
    %c8_i32_28 = arith.constant 8 : i32
    %26 = arith.muli %arg1, %c8_i32_28 : i32
    %c0_i32_29 = arith.constant 0 : i32
    %27 = arith.addi %26, %c0_i32_29 : i32
    %c0_30 = arith.constant 0 : index
    %c0_31 = arith.constant 0 : index
    %28 = arith.index_cast %27 : i32 to index
    %c1_32 = arith.constant 1 : index
    %c0_33 = arith.constant 0 : index
    %29 = vector.load %arg2[%c0_30, %c0_31, %28, %c1_32, %c0_33] : memref<1x4x9x9x4xbf16, #tpu.memory_space<vmem>>, vector<1x1x8x8x4xbf16>
    %30 = vector.shape_cast %29 : vector<1x1x8x8x4xbf16> to vector<8x8x4xbf16>
    %c0_34 = arith.constant 0 : index
    %c0_35 = arith.constant 0 : index
    %31 = vector.load %arg6[%c0_34, %c0_35] : memref<64x128xf32, #tpu.memory_space<vmem>>, vector<64x128xf32>
    %32 = vector.shape_cast %30 : vector<8x8x4xbf16> to vector<64x4xbf16>
    %c0_36 = arith.constant 0 : index
    %c2 = arith.constant 2 : index
    %c0_37 = arith.constant 0 : index
    %c0_38 = arith.constant 0 : index
    %33 = vector.load %arg3[%c0_36, %c2, %c0_37, %c0_38] : memref<3x3x4x128xbf16, #tpu.memory_space<vmem>>, vector<1x1x4x128xbf16>
    %34 = vector.shape_cast %33 : vector<1x1x4x128xbf16> to vector<4x128xbf16>
    %cst_39 = arith.constant dense<0.000000e+00> : vector<64x128xf32>
    %35 = tpu.matmul %32, %34, %cst_39 {dimension_numbers = #tpu.dot_dimension_numbers<[1], [0], [0], [1], [0, 0, 1, 1], [], []>} : vector<64x4xbf16>, vector<4x128xbf16>, vector<64x128xf32> -> vector<64x128xf32>
    %36 = arith.addf %31, %35 : vector<64x128xf32>
    %c0_40 = arith.constant 0 : index
    %c0_41 = arith.constant 0 : index
    %37 = vector.load %arg6[%c0_40, %c0_41] : memref<64x128xf32, #tpu.memory_space<vmem>>, vector<64x128xf32>
    tpu.vector_store %arg6[%c0_40, %c0_41], %36 {strides = array<i32>} : memref<64x128xf32, #tpu.memory_space<vmem>>, vector<64x128xf32>,
    %c8_i32_42 = arith.constant 8 : i32
    %38 = arith.muli %arg1, %c8_i32_42 : i32
    %c0_i32_43 = arith.constant 0 : i32
    %39 = arith.addi %38, %c0_i32_43 : i32
    %c0_44 = arith.constant 0 : index
    %c2_45 = arith.constant 2 : index
    %40 = arith.index_cast %39 : i32 to index
    %c0_46 = arith.constant 0 : index
    %c0_47 = arith.constant 0 : index
    %41 = vector.load %arg2[%c0_44, %c2_45, %40, %c0_46, %c0_47] : memref<1x4x9x9x4xbf16, #tpu.memory_space<vmem>>, vector<1x1x8x8x4xbf16>
    %42 = vector.shape_cast %41 : vector<1x1x8x8x4xbf16> to vector<8x8x4xbf16>
    %c0_48 = arith.constant 0 : index
    %c0_49 = arith.constant 0 : index
    %43 = vector.load %arg6[%c0_48, %c0_49] : memref<64x128xf32, #tpu.memory_space<vmem>>, vector<64x128xf32>
    %44 = vector.shape_cast %42 : vector<8x8x4xbf16> to vector<64x4xbf16>
    %c1_50 = arith.constant 1 : index
    %c0_51 = arith.constant 0 : index
    %c0_52 = arith.constant 0 : index
    %c0_53 = arith.constant 0 : index
    %45 = vector.load %arg3[%c1_50, %c0_51, %c0_52, %c0_53] : memref<3x3x4x128xbf16, #tpu.memory_space<vmem>>, vector<1x1x4x128xbf16>
    %46 = vector.shape_cast %45 : vector<1x1x4x128xbf16> to vector<4x128xbf16>
    %cst_54 = arith.constant dense<0.000000e+00> : vector<64x128xf32>
    %47 = tpu.matmul %44, %46, %cst_54 {dimension_numbers = #tpu.dot_dimension_numbers<[1], [0], [0], [1], [0, 0, 1, 1], [], []>} : vector<64x4xbf16>, vector<4x128xbf16>, vector<64x128xf32> -> vector<64x128xf32>
    %48 = arith.addf %43, %47 : vector<64x128xf32>
    %c0_55 = arith.constant 0 : index
    %c0_56 = arith.constant 0 : index
    %49 = vector.load %arg6[%c0_55, %c0_56] : memref<64x128xf32, #tpu.memory_space<vmem>>, vector<64x128xf32>
    tpu.vector_store %arg6[%c0_55, %c0_56], %48 {strides = array<i32>} : memref<64x128xf32, #tpu.memory_space<vmem>>, vector<64x128xf32>,
    %c8_i32_57 = arith.constant 8 : i32
    %50 = arith.muli %arg1, %c8_i32_57 : i32
    %c0_i32_58 = arith.constant 0 : i32
    %51 = arith.addi %50, %c0_i32_58 : i32
    %c0_59 = arith.constant 0 : index
    %c3 = arith.constant 3 : index
    %52 = arith.index_cast %51 : i32 to index
    %c0_60 = arith.constant 0 : index
    %c0_61 = arith.constant 0 : index
    %53 = vector.load %arg2[%c0_59, %c3, %52, %c0_60, %c0_61] : memref<1x4x9x9x4xbf16, #tpu.memory_space<vmem>>, vector<1x1x8x8x4xbf16>
    %54 = vector.shape_cast %53 : vector<1x1x8x8x4xbf16> to vector<8x8x4xbf16>
    %c0_62 = arith.constant 0 : index
    %c0_63 = arith.constant 0 : index
    %55 = vector.load %arg6[%c0_62, %c0_63] : memref<64x128xf32, #tpu.memory_space<vmem>>, vector<64x128xf32>
    %56 = vector.shape_cast %54 : vector<8x8x4xbf16> to vector<64x4xbf16>
    %c1_64 = arith.constant 1 : index
    %c1_65 = arith.constant 1 : index
    %c0_66 = arith.constant 0 : index
    %c0_67 = arith.constant 0 : index
    %57 = vector.load %arg3[%c1_64, %c1_65, %c0_66, %c0_67] : memref<3x3x4x128xbf16, #tpu.memory_space<vmem>>, vector<1x1x4x128xbf16>
    %58 = vector.shape_cast %57 : vector<1x1x4x128xbf16> to vector<4x128xbf16>
    %cst_68 = arith.constant dense<0.000000e+00> : vector<64x128xf32>
    %59 = tpu.matmul %56, %58, %cst_68 {dimension_numbers = #tpu.dot_dimension_numbers<[1], [0], [0], [1], [0, 0, 1, 1], [], []>} : vector<64x4xbf16>, vector<4x128xbf16>, vector<64x128xf32> -> vector<64x128xf32>
    %60 = arith.addf %55, %59 : vector<64x128xf32>
    %c0_69 = arith.constant 0 : index
    %c0_70 = arith.constant 0 : index
    %61 = vector.load %arg6[%c0_69, %c0_70] : memref<64x128xf32, #tpu.memory_space<vmem>>, vector<64x128xf32>
    tpu.vector_store %arg6[%c0_69, %c0_70], %60 {strides = array<i32>} : memref<64x128xf32, #tpu.memory_space<vmem>>, vector<64x128xf32>,
    %c8_i32_71 = arith.constant 8 : i32
    %62 = arith.muli %arg1, %c8_i32_71 : i32
    %c0_i32_72 = arith.constant 0 : i32
    %63 = arith.addi %62, %c0_i32_72 : i32
    %c0_73 = arith.constant 0 : index
    %c2_74 = arith.constant 2 : index
    %64 = arith.index_cast %63 : i32 to index
    %c1_75 = arith.constant 1 : index
    %c0_76 = arith.constant 0 : index
    %65 = vector.load %arg2[%c0_73, %c2_74, %64, %c1_75, %c0_76] : memref<1x4x9x9x4xbf16, #tpu.memory_space<vmem>>, vector<1x1x8x8x4xbf16>
    %66 = vector.shape_cast %65 : vector<1x1x8x8x4xbf16> to vector<8x8x4xbf16>
    %c0_77 = arith.constant 0 : index
    %c0_78 = arith.constant 0 : index
    %67 = vector.load %arg6[%c0_77, %c0_78] : memref<64x128xf32, #tpu.memory_space<vmem>>, vector<64x128xf32>
    %68 = vector.shape_cast %66 : vector<8x8x4xbf16> to vector<64x4xbf16>
    %c1_79 = arith.constant 1 : index
    %c2_80 = arith.constant 2 : index
    %c0_81 = arith.constant 0 : index
    %c0_82 = arith.constant 0 : index
    %69 = vector.load %arg3[%c1_79, %c2_80, %c0_81, %c0_82] : memref<3x3x4x128xbf16, #tpu.memory_space<vmem>>, vector<1x1x4x128xbf16>
    %70 = vector.shape_cast %69 : vector<1x1x4x128xbf16> to vector<4x128xbf16>
    %cst_83 = arith.constant dense<0.000000e+00> : vector<64x128xf32>
    %71 = tpu.matmul %68, %70, %cst_83 {dimension_numbers = #tpu.dot_dimension_numbers<[1], [0], [0], [1], [0, 0, 1, 1], [], []>} : vector<64x4xbf16>, vector<4x128xbf16>, vector<64x128xf32> -> vector<64x128xf32>
    %72 = arith.addf %67, %71 : vector<64x128xf32>
    %c0_84 = arith.constant 0 : index
    %c0_85 = arith.constant 0 : index
    %73 = vector.load %arg6[%c0_84, %c0_85] : memref<64x128xf32, #tpu.memory_space<vmem>>, vector<64x128xf32>
    tpu.vector_store %arg6[%c0_84, %c0_85], %72 {strides = array<i32>} : memref<64x128xf32, #tpu.memory_space<vmem>>, vector<64x128xf32>,
    %c8_i32_86 = arith.constant 8 : i32
    %74 = arith.muli %arg1, %c8_i32_86 : i32
    %c1_i32 = arith.constant 1 : i32
    %75 = arith.addi %74, %c1_i32 : i32
    %c0_87 = arith.constant 0 : index
    %c0_88 = arith.constant 0 : index
    %76 = arith.index_cast %75 : i32 to index
    %c0_89 = arith.constant 0 : index
    %c0_90 = arith.constant 0 : index
    %77 = vector.load %arg2[%c0_87, %c0_88, %76, %c0_89, %c0_90] : memref<1x4x9x9x4xbf16, #tpu.memory_space<vmem>>, vector<1x1x8x8x4xbf16>
    %78 = vector.shape_cast %77 : vector<1x1x8x8x4xbf16> to vector<8x8x4xbf16>
    %c0_91 = arith.constant 0 : index
    %c0_92 = arith.constant 0 : index
    %79 = vector.load %arg6[%c0_91, %c0_92] : memref<64x128xf32, #tpu.memory_space<vmem>>, vector<64x128xf32>
    %80 = vector.shape_cast %78 : vector<8x8x4xbf16> to vector<64x4xbf16>
    %c2_93 = arith.constant 2 : index
    %c0_94 = arith.constant 0 : index
    %c0_95 = arith.constant 0 : index
    %c0_96 = arith.constant 0 : index
    %81 = vector.load %arg3[%c2_93, %c0_94, %c0_95, %c0_96] : memref<3x3x4x128xbf16, #tpu.memory_space<vmem>>, vector<1x1x4x128xbf16>
    %82 = vector.shape_cast %81 : vector<1x1x4x128xbf16> to vector<4x128xbf16>
    %cst_97 = arith.constant dense<0.000000e+00> : vector<64x128xf32>
    %83 = tpu.matmul %80, %82, %cst_97 {dimension_numbers = #tpu.dot_dimension_numbers<[1], [0], [0], [1], [0, 0, 1, 1], [], []>} : vector<64x4xbf16>, vector<4x128xbf16>, vector<64x128xf32> -> vector<64x128xf32>
    %84 = arith.addf %79, %83 : vector<64x128xf32>
    %c0_98 = arith.constant 0 : index
    %c0_99 = arith.constant 0 : index
    %85 = vector.load %arg6[%c0_98, %c0_99] : memref<64x128xf32, #tpu.memory_space<vmem>>, vector<64x128xf32>
    tpu.vector_store %arg6[%c0_98, %c0_99], %84 {strides = array<i32>} : memref<64x128xf32, #tpu.memory_space<vmem>>, vector<64x128xf32>,
    %c8_i32_100 = arith.constant 8 : i32
    %86 = arith.muli %arg1, %c8_i32_100 : i32
    %c1_i32_101 = arith.constant 1 : i32
    %87 = arith.addi %86, %c1_i32_101 : i32
    %c0_102 = arith.constant 0 : index
    %c1_103 = arith.constant 1 : index
    %88 = arith.index_cast %87 : i32 to index
    %c0_104 = arith.constant 0 : index
    %c0_105 = arith.constant 0 : index
    %89 = vector.load %arg2[%c0_102, %c1_103, %88, %c0_104, %c0_105] : memref<1x4x9x9x4xbf16, #tpu.memory_space<vmem>>, vector<1x1x8x8x4xbf16>
    %90 = vector.shape_cast %89 : vector<1x1x8x8x4xbf16> to vector<8x8x4xbf16>
    %c0_106 = arith.constant 0 : index
    %c0_107 = arith.constant 0 : index
    %91 = vector.load %arg6[%c0_106, %c0_107] : memref<64x128xf32, #tpu.memory_space<vmem>>, vector<64x128xf32>
    %92 = vector.shape_cast %90 : vector<8x8x4xbf16> to vector<64x4xbf16>
    %c2_108 = arith.constant 2 : index
    %c1_109 = arith.constant 1 : index
    %c0_110 = arith.constant 0 : index
    %c0_111 = arith.constant 0 : index
    %93 = vector.load %arg3[%c2_108, %c1_109, %c0_110, %c0_111] : memref<3x3x4x128xbf16, #tpu.memory_space<vmem>>, vector<1x1x4x128xbf16>
    %94 = vector.shape_cast %93 : vector<1x1x4x128xbf16> to vector<4x128xbf16>
    %cst_112 = arith.constant dense<0.000000e+00> : vector<64x128xf32>
    %95 = tpu.matmul %92, %94, %cst_112 {dimension_numbers = #tpu.dot_dimension_numbers<[1], [0], [0], [1], [0, 0, 1, 1], [], []>} : vector<64x4xbf16>, vector<4x128xbf16>, vector<64x128xf32> -> vector<64x128xf32>
    %96 = arith.addf %91, %95 : vector<64x128xf32>
    %c0_113 = arith.constant 0 : index
    %c0_114 = arith.constant 0 : index
    %97 = vector.load %arg6[%c0_113, %c0_114] : memref<64x128xf32, #tpu.memory_space<vmem>>, vector<64x128xf32>
    tpu.vector_store %arg6[%c0_113, %c0_114], %96 {strides = array<i32>} : memref<64x128xf32, #tpu.memory_space<vmem>>, vector<64x128xf32>,
    %c8_i32_115 = arith.constant 8 : i32
    %98 = arith.muli %arg1, %c8_i32_115 : i32
    %c1_i32_116 = arith.constant 1 : i32
    %99 = arith.addi %98, %c1_i32_116 : i32
    %c0_117 = arith.constant 0 : index
    %c0_118 = arith.constant 0 : index
    %100 = arith.index_cast %99 : i32 to index
    %c1_119 = arith.constant 1 : index
    %c0_120 = arith.constant 0 : index
    %101 = vector.load %arg2[%c0_117, %c0_118, %100, %c1_119, %c0_120] : memref<1x4x9x9x4xbf16, #tpu.memory_space<vmem>>, vector<1x1x8x8x4xbf16>
    %102 = vector.shape_cast %101 : vector<1x1x8x8x4xbf16> to vector<8x8x4xbf16>
    %c0_121 = arith.constant 0 : index
    %c0_122 = arith.constant 0 : index
    %103 = vector.load %arg6[%c0_121, %c0_122] : memref<64x128xf32, #tpu.memory_space<vmem>>, vector<64x128xf32>
    %104 = vector.shape_cast %102 : vector<8x8x4xbf16> to vector<64x4xbf16>
    %c2_123 = arith.constant 2 : index
    %c2_124 = arith.constant 2 : index
    %c0_125 = arith.constant 0 : index
    %c0_126 = arith.constant 0 : index
    %105 = vector.load %arg3[%c2_123, %c2_124, %c0_125, %c0_126] : memref<3x3x4x128xbf16, #tpu.memory_space<vmem>>, vector<1x1x4x128xbf16>
    %106 = vector.shape_cast %105 : vector<1x1x4x128xbf16> to vector<4x128xbf16>
    %cst_127 = arith.constant dense<0.000000e+00> : vector<64x128xf32>
    %107 = tpu.matmul %104, %106, %cst_127 {dimension_numbers = #tpu.dot_dimension_numbers<[1], [0], [0], [1], [0, 0, 1, 1], [], []>} : vector<64x4xbf16>, vector<4x128xbf16>, vector<64x128xf32> -> vector<64x128xf32>
    %108 = arith.addf %103, %107 : vector<64x128xf32>
    %c0_128 = arith.constant 0 : index
    %c0_129 = arith.constant 0 : index
    %109 = vector.load %arg6[%c0_128, %c0_129] : memref<64x128xf32, #tpu.memory_space<vmem>>, vector<64x128xf32>
    tpu.vector_store %arg6[%c0_128, %c0_129], %108 {strides = array<i32>} : memref<64x128xf32, #tpu.memory_space<vmem>>, vector<64x128xf32>,
    %c0_130 = arith.constant 0 : index
    %c0_131 = arith.constant 0 : index
    %110 = vector.load %arg6[%c0_130, %c0_131] : memref<64x128xf32, #tpu.memory_space<vmem>>, vector<64x128xf32>
    %c0_132 = arith.constant 0 : index
    %c0_133 = arith.constant 0 : index
    %111 = vector.load %arg4[%c0_132, %c0_133] : memref<1x128xf32, #tpu.memory_space<vmem>>, vector<1x128xf32>
    %112 = vector.broadcast %111 : vector<1x128xf32> to vector<64x128xf32>
    %113 = arith.addf %110, %112 : vector<64x128xf32>
    %cst_134 = arith.constant 0.000000e+00 : f32
    %114 = vector.broadcast %cst_134 : f32 to vector<64x128xf32>
    %115 = arith.maximumf %113, %114 : vector<64x128xf32>
    %c0_135 = arith.constant 0 : index
    %c0_136 = arith.constant 0 : index
    %116 = vector.load %arg5[%c0_135, %c0_136] : memref<64x128xf32, #tpu.memory_space<vmem>>, vector<64x128xf32>
    tpu.vector_store %arg5[%c0_135, %c0_136], %115 {strides = array<i32>} : memref<64x128xf32, #tpu.memory_space<vmem>>, vector<64x128xf32>,
    return
  }
  func.func @transform_0(%arg0: i32, %arg1: i32) -> (i32, i32, i32, i32, i32) {
    %c0_i32 = arith.constant 0 : i32
    %c0_i32_0 = arith.constant 0 : i32
    %c0_i32_1 = arith.constant 0 : i32
    %c0_i32_2 = arith.constant 0 : i32
    %c0_i32_3 = arith.constant 0 : i32
    return %arg0, %c0_i32, %c0_i32_0, %c0_i32_1, %c0_i32_2 : i32, i32, i32, i32, i32
  }
  func.func @transform_1(%arg0: i32, %arg1: i32) -> (i32, i32, i32, i32) {
    %c0_i32 = arith.constant 0 : i32
    %c0_i32_0 = arith.constant 0 : i32
    %c0_i32_1 = arith.constant 0 : i32
    %c0_i32_2 = arith.constant 0 : i32
    %c0_i32_3 = arith.constant 0 : i32
    return %c0_i32, %c0_i32_0, %c0_i32_1, %c0_i32_2 : i32, i32, i32, i32
  }
  func.func @transform_2(%arg0: i32, %arg1: i32) -> (i32, i32) {
    %c0_i32 = arith.constant 0 : i32
    %c0_i32_0 = arith.constant 0 : i32
    %c0_i32_1 = arith.constant 0 : i32
    return %c0_i32, %c0_i32_0 : i32, i32
  }
  func.func @transform_3(%arg0: i32, %arg1: i32) -> (i32, i32) {
    %c1_i32 = arith.constant 1 : i32
    %0 = arith.muli %arg0, %c1_i32 : i32
    %1 = arith.addi %0, %arg1 : i32
    %c0_i32 = arith.constant 0 : i32
    %c0_i32_0 = arith.constant 0 : i32
    return %1, %c0_i32 : i32, i32
  }
}

</mosaic_0001>

<bundles_post_ra>
// kernel: tpu_custom_call.1
= control target key start
LH: loop header
LB: loop body
LE: loop exit
PB: predicated region body
PF: predicated region fallthrough
CT: control target
= control target key end

     0   :  { %8 = vsyncpa [#allocation4], 0  ;;  %s2772_s0 = inlined_call_operand.vmem [shape: bf16[2,4,9,9,4], index: 0, kind: input, shape index: {}]   ;;  %s2773_s1 = inlined_call_operand.vmem [shape: bf16[3,3,4,128], index: 1, kind: input, shape index: {}]   ;;  %s2774_s2 = inlined_call_operand.vmem [shape: f32[1,128], index: 2, kind: input, shape index: {}]   ;;  %s2775_s3 = inlined_call_operand.hbm [shape: f32[128,128], index: 3, kind: output, shape index: {}]  }
   0x1   :  { %10 = vsyncpa [#allocation4 + $0x1], 0  ;;  %s2404_s12 = smov 0   ;;  %s2406_s13 = smov 0  }
   0x2   :  { %s2408_s14 = smov 0   ;;  %s2410_s15 = smov 0  }
   0x3   :  { %s2412_s16 = smov 0   ;;  %s2414_s17 = smov 0  }
   0x4 LB: > { %s1908_s18 = sadd.s32 4294967295, %s2379_s17   ;;  %s1909_s19 = sadd.s32 4294967294, %s2379_s17   ;;  %s2379_s17 = sphi %s2414_s17, %s16_s17   ;;  %s2375_s16 = sphi %s2412_s16, %s2784_s16   ;;  %s2371_s15 = sphi %s2410_s15, %s2783_s15   ;;  %s2367_s14 = sphi %s2408_s14, %s2782_s14   ;;  %s2363_s13 = sphi %s2406_s13, %s2781_s13   ;;  %s2359_s12 = sphi %s2404_s12, %s2780_s12  }
   0x5   : > { %s28_s20 = sadd.s32 1, %s2375_s16  ;;  %s105_s21 = sadd.s32 1, %s2367_s14 }
   0x6   : > { %p30_p0 = scmp.ge.s32.totalorder %s28_s20, 2  ;;  %p115_p1 = scmp.ne.s32.totalorder %s2367_s14, %s2363_s13 }
   0x7   : > { %p116_p2 = scmp.eq.s32.totalorder %s1908_s18, 1  ;;  %p121_p3 = scmp.ne.s32.totalorder %s2363_s13, %s2359_s12 }
   0x8   : > { %s2786_s20 = smov (%p30_p0, %s28_s20), 0  ;;  %p122_p5 = scmp.eq.s32.totalorder %s1909_s19, 1 }
   0x9   : > { %p2444_p4 = por %p116_p2, %p115_p1  ;;  %s102_s23 = ssub.s32 %s2375_s16, %s2786_s20 }
   0xa   : > { %p1912_p6 = scmp.ge.s32.totalorder %s2379_s17, 1  ;;  %p103_p7 = scmp.eq.s32.totalorder %s102_s23, 0 }
   0xb   : > { %p2451_p8 = por %p122_p5, %p121_p3  ;;  %p154_p9 = scmp.lt.s32.totalorder %s2379_s17, 3 }
   0xc   : > { %s2457_s25 = scalar_select %p103_p7, %s2367_s14, %s105_s21  }
   0xd   : > { %p155_p10 = pnand %p1912_p6, %p154_p9 }
   0xe   : > { %p178_p11 = scmp.lt.s32.totalorder (!%p155_p10), %s2371_s15, 1  ;;  %s2073_s10 = sshll.u32 (!%p155_p10), %s2371_s15, 10 }
   0xf   : > { %158 = sbr.rel (%p155_p10) target bundleno = 321 (0x141), region = 32  ;;  %s2719_s21 = scalar_lea.hbm (!%p155_p10), %s2775_s3, %s2073_s10 }
  0x10   : > { %s2381_s26 = smov (!%p155_p10), [#allocation3]  }
  0x11   : > { %s2307_s27 = sshll.u32 (!%p155_p10), %s2381_s26, 4  ;;  %s2308_s27 = int_to_ptr.vmem [resolvable:$false] %s2307_s27 }
  0x12   : > { %s2309_s28 = scalar_lea.vmem (!%p155_p10), %s2308_s27, 2048 }
  0x14   : > { %v214_v0 = vld [vmem:[%s2773_s1] sm:$0x3]  ;;  %vm248_vm0 = vcmask 1041408   ;;  %v1931_v2 = vld [vmem:[%s2773_s1 + $0x2] sm:$0x3]  ;;  %s179_s5 = scalar_select %p178_p11, %s2371_s15, 1 }
  0x15   : > { %2212 = vmatprep.subr.msk.bf16.mxu1 %vm248_vm0, %v214_v0  ;;  %2211 = vmatprep.subr.msk.bf16.mxu0 %vm248_vm0, %v214_v0  ;;  %v250_v1 = vsel %vm248_vm0, %v214_v0, 0  ;;  %v1940_v3 = vld [vmem:[%s2773_s1 + $0x4] sm:$0x3]  ;;  %vm235_vm1 = vcmask 31744   ;;  %v387_v4 = vsel %vm248_vm0, %v1931_v2, 0 }
  0x16   : > { %2210 = vmatpush3.bf16.msra.mxu1 %v250_v1  ;;  %2120 = vmatpush3.bf16.msra.mxu0 %v250_v1  ;;  %s2221_s6 = smul.u32 288, %s179_s5  ;;  %v636_v5 = vsel %vm248_vm0, %v1940_v3, 0  ;;  %v1957_v7 = vld [vmem:[%s2773_s1 + $0x6] sm:$0x3]  ;;  %v1974_v8 = vld [vmem:[%s2773_s1 + $0x8] sm:$0x3] }
  0x17   : > { %2213 = vmatprep.subr.msk.bf16.mxu1 %vm248_vm0, %v1931_v2  ;;  %2214 = vmatprep.subr.msk.bf16.mxu0 %vm248_vm0, %v1940_v3  ;;  %vm494_vm2 = vsmask.f32 3328  ;;  %vm495_vm3 = vsmask.f32 7440  ;;  %v773_v13 = vsel %vm248_vm0, %v1957_v7, 0  ;;  %v2499_v14 = vsel %vm248_vm0, %v1974_v8, 0 }
  0x18   : > { %s2478_s9 = scalar_lea.vmem %s2772_s0, %s2221_s6  ;;  %v2516_v38 = vld [vmem:[%s2773_s1 + $0xa] sm:$0x3]  ;;  %vm2520_vm4 = vmor %vm494_vm2, %vm495_vm3  ;;  %s175_s5 = sand.u32 1, %s2363_s13  }
  0x19   : > { %v2279_v6 = vld [vmem:[%s2478_s9] ss:$8 sps:$4 sm:$0xff]   ;;  %v2281_v10 = vld [vmem:[%s2478_s9 + $0x10] ss:$8 sps:$4 sm:$0xff]   ;;  %v471_v16 = vld [vmem:[%s2478_s9 + $0x4] sm:$0x1] }
  0x1a   : > { %v2280_v9 = vld [vmem:[%s2478_s9 + $0x20] ss:$8 sps:$4 sm:$0xff]   ;;  %2121 = vmatprep.mubr.msk.bf16.mxu0 %vm235_vm1, %v2279_v6  ;;  %v2282_v11 = vld [vmem:[%s2478_s9 + $0x30] ss:$8 sps:$4 sm:$0xff]   ;;  %v473_v19 = vld [vmem:[%s2478_s9 + $0xc] sm:$0x1] }
  0x1b   : > { %2125 = vmatprep.mubr.msk.bf16.mxu1 %vm235_vm1, %v2280_v9  ;;  %2122 = vmatmul.mubr.msk.bf16.vlgmr.msra.gmra.mxu0 %vm235_vm1, %v2281_v10  ;;  %v2283_v12 = vld [vmem:[%s2478_s9 + $0x48] ss:$8 sps:$4 sm:$0xff]   ;;  %v470_v15 = vld [vmem:[%s2478_s9] sm:$0xf]  ;;  %v507_v22 = vshll.u32 %v471_v16, 16  ;;  %v521_v25 = vshll.u32 %v473_v19, 16 }
  0x1c   : > { %2126 = vmatmul.mubr.msk.bf16.vlgmr.msra.gmra.mxu1 %vm235_vm1, %v2282_v11  ;;  %2140 = vmatpush3.bf16.msra.mxu0 %v636_v5  ;;  %v472_v17 = vld [vmem:[%s2478_s9 + $0x8] sm:$0xf]  ;;  %v2284_v18 = vld [vmem:[%s2478_s9 + $0x58] ss:$8 sps:$4 sm:$0xff]   ;;  %v498_v20 = vshrl.u32 %v470_v15, 16  ;;  %v501_v21 = vshll.u32 %v470_v15, 16 }
  0x1d   : > { %2130 = vmatpush3.bf16.msra.mxu1 %v387_v4  ;;  %2131 = vmatprep.mubr.msk.bf16.mxu1 %vm235_vm1, %v2283_v12  ;;  %v512_v23 = vshrl.u32 %v472_v17, 16  ;;  %v515_v24 = vshll.u32 %v472_v17, 16  ;;  %v474_v26 = vld [vmem:[%s2478_s9 + $0x10] sm:$0xf]  ;;  %v475_v27 = vld [vmem:[%s2478_s9 + $0x14] sm:$0x1] }
  0x1e   : > { %2215 = vmatprep.subr.msk.bf16.mxu1 %vm248_vm0, %v1957_v7  ;;  %2216 = vmatprep.subr.msk.bf16.mxu0 %vm248_vm0, %v1974_v8  ;;  %v500_v28 = vrot.slane %v498_v20, 4  ;;  %v503_v29 = vrot.slane %v501_v21, 5  ;;  %v509_v30 = vrot.slane %v507_v22, 5  ;;  %v476_v32 = vld [vmem:[%s2478_s9 + $0x18] sm:$0xf]  ;;  %v523_v34 = vrot.slane %v521_v25, 5 }
  0x1f   : > { %v514_v31 = vrot.slane %v512_v23, 4  ;;  %v517_v33 = vrot.slane %v515_v24, 5  ;;  %v477_v35 = vld [vmem:[%s2478_s9 + $0x1c] sm:$0x1]  ;;  %v526_v36 = vshrl.u32 %v474_v26, 16  ;;  %v529_v37 = vshll.u32 %v474_v26, 16 }
  0x20   : > { %v504_v39 = vor.u32 %v503_v29, %v500_v28  ;;  %v535_v40 = vshll.u32 %v475_v27, 16  ;;  %v540_v41 = vshrl.u32 %v476_v32, 16  ;;  %v543_v42 = vshll.u32 %v476_v32, 16  ;;  %v2285_v52 = vld [vmem:[%s2478_s9 + $0x68] ss:$8 sps:$4 sm:$0xff]   ;;  %s1913_s8 = sshll.u32 %s175_s5, 6 }
  0x21   : > { %v518_v44 = vor.u32 %v517_v33, %v514_v31  ;;  %v528_v45 = vrot.slane %v526_v36, 4  ;;  %v531_v46 = vrot.slane %v529_v37, 5  ;;  %v549_v47 = vshll.u32 %v477_v35, 16  ;;  %v2286_v58 = vld [vmem:[%s2478_s9 + $0x78] ss:$8 sps:$4 sm:$0xff]   ;;  %s2727_s23 = scalar_lea.sflag [#allocation4], %s175_s5 }
  0x22   : > { %v505_v48 = vrot.slane %v504_v39, 4  ;;  %v537_v49 = vrot.slane %v535_v40, 5  ;;  %v542_v50 = vrot.slane %v540_v41, 4  ;;  %v545_v51 = vrot.slane %v543_v42, 5  ;;  %v478_v59 = vld [vmem:[%s2478_s9 + $0x20] sm:$0xf] }
  0x23   : > { %v519_v53 = vrot.slane %v518_v44, 4  ;;  %v532_v54 = vor.u32 %v531_v46, %v528_v45  ;;  %v551_v55 = vrot.slane %v549_v47, 5  ;;  %v479_v60 = vld [vmem:[%s2478_s9 + $0x24] sm:$0x1]  ;;  %v480_v63 = vld [vmem:[%s2478_s9 + $0x28] sm:$0xf] }
  0x24   : > { %2132 = vmatmul.mubr.msk.bf16.vlgmr.msra.gmra.mxu1 %vm235_vm1, %v2284_v18  ;;  %v510_v56 = vsel %vm2520_vm4, %v505_v48, %v509_v30  ;;  %v546_v57 = vor.u32 %v545_v51, %v542_v50  ;;  %v481_v0 = vld [vmem:[%s2478_s9 + $0x2c] sm:$0x1]  ;;  %v554_v1 = vshrl.u32 %v478_v59, 16  ;;  %v557_v4 = vshll.u32 %v478_v59, 16  ;;  %v482_v6 = vld [vmem:[%s2478_s9 + $0x30] sm:$0xf] }
  0x25   : > { %2150 = vmatpush3.bf16.msra.mxu1 %v773_v13  ;;  %2135 = vmatprep.mubr.msk.bf16.mxu1 %vm235_vm1, %v2285_v52  ;;  %v524_v61 = vsel %vm2520_vm4, %v519_v53, %v523_v34  ;;  %v533_v62 = vrot.slane %v532_v54, 4  ;;  %v563_v5 = vshll.u32 %v479_v60, 16  ;;  %v568_v9 = vshrl.u32 %v480_v63, 16  ;;  %v483_v11 = vld [vmem:[%s2478_s9 + $0x34] sm:$0x1] }
  0x26   : > { %2217 = vmatprep.subr.msk.bf16.mxu1 %vm248_vm0, %v2516_v38  ;;  %v1941_v2 = vcombine.low %v510_v56, %v524_v61  ;;  %v547_v3 = vrot.slane %v546_v57, 4  ;;  %v556_v8 = vrot.slane %v554_v1, 4  ;;  %v571_v10 = vshll.u32 %v480_v63, 16  ;;  %v484_v17 = vld [vmem:[%s2478_s9 + $0x38] sm:$0xf] }
  0x27   : > { %v538_v7 = vsel %vm2520_vm4, %v533_v62, %v537_v49  ;;  %v559_v13 = vrot.slane %v557_v4, 5  ;;  %v565_v15 = vrot.slane %v563_v5, 5  ;;  %v577_v16 = vshll.u32 %v481_v0, 16  ;;  %v2016_v18 = vld [vmem:[%s2773_s1 + $0xc] sm:$0x3] }
  0x28   : > { %2141 = vmatprep.mubr.msk.bf16.mxu0 %vm235_vm1, %v1941_v2  ;;  %v552_v12 = vsel %vm2520_vm4, %v547_v3, %v551_v55  ;;  %v570_v20 = vrot.slane %v568_v9, 4  ;;  %v573_v21 = vrot.slane %v571_v10, 5  ;;  %v485_v22 = vld [vmem:[%s2478_s9 + $0x3c] sm:$0x1]  ;;  %v582_v23 = vshrl.u32 %v482_v6, 16 }
  0x29   : > { %v1942_v19 = vcombine.low %v538_v7, %v552_v12  ;;  %v560_v24 = vor.u32 %v559_v13, %v556_v8  ;;  %v579_v25 = vrot.slane %v577_v16, 5  ;;  %v585_v26 = vshll.u32 %v482_v6, 16  ;;  %v2287_v35 = vld [vmem:[%s2478_s9 + $0x90] ss:$8 sps:$4 sm:$0xff]   ;;  %v2288_v44 = vld [vmem:[%s2478_s9 + $0xa0] ss:$8 sps:$4 sm:$0xff]  }
  0x2a   : > { %v591_v27 = vshll.u32 %v483_v11, 16  ;;  %v574_v28 = vor.u32 %v573_v21, %v570_v20  ;;  %v584_v29 = vrot.slane %v582_v23, 4  ;;  %v596_v30 = vshrl.u32 %v484_v17, 16  ;;  %v2033_v51 = vld [vmem:[%s2773_s1 + $0xe] sm:$0x3] }
  0x2b   : > { %2142 = vmatmul.mubr.msk.bf16.vlgmr.msra.gmra.mxu0 %vm235_vm1, %v1942_v19  ;;  %v599_v31 = vshll.u32 %v484_v17, 16  ;;  %v561_v32 = vrot.slane %v560_v24, 4  ;;  %v587_v33 = vrot.slane %v585_v26, 5  ;;  %v605_v34 = vshll.u32 %v485_v22, 16  ;;  %v2291_v53 = vld [vmem:[%s2478_s9 + $0xb0] ss:$8 sps:$4 sm:$0xff]  }
  0x2c   : > { %2136 = vmatmul.mubr.msk.bf16.gmra.mxu1 %vm235_vm1, %v2286_v58  ;;  %2160 = vmatpush3.bf16.msra.mxu0 %v2499_v14  ;;  %v575_v36 = vrot.slane %v574_v28, 4  ;;  %v598_v37 = vrot.slane %v596_v30, 4  ;;  %v593_v42 = vrot.slane %v591_v27, 5  ;;  %v1156_v49 = vsel %vm248_vm0, %v2516_v38, 0  ;;  %v2289_v38 = vld [vmem:[%s2478_s9 + $0xd8] ss:$8 sps:$4 sm:$0xff]  }
  0x2d   : > { %v601_v39 = vrot.slane %v599_v31, 5  ;;  %2218 = vmatprep.subr.msk.bf16.mxu0 %vm248_vm0, %v2016_v18  ;;  %v566_v40 = vsel %vm2520_vm4, %v561_v32, %v565_v15  ;;  %v588_v41 = vor.u32 %v587_v33, %v584_v29  ;;  %2151 = vmatprep.mubr.msk.bf16.mxu1 %vm235_vm1, %v2287_v35  ;;  %v607_v46 = vrot.slane %v605_v34, 5  ;;  %v2292_v57 = vld [vmem:[%s2478_s9 + $0xc0] ss:$8 sps:$4 sm:$0xff]   ;;  %v1983_v58 = vld [vmem:[%s2478_s9 + $0x90] sm:$0xf] }
  0x2e   : > { %v580_v14 = vsel %vm2520_vm4, %v575_v36, %v579_v25  ;;  %v1294_v56 = vsel %vm248_vm0, %v2016_v18, 0  ;;  %v1984_v59 = vld [vmem:[%s2478_s9 + $0x94] sm:$0x1]  ;;  %v1985_v60 = vld [vmem:[%s2478_s9 + $0x98] sm:$0xf]  ;;  %v1018_v62 = vshrl.u32 %v1983_v58, 16 }
  0x2f   : > { %v602_v45 = vor.u32 %v601_v39, %v598_v37  ;;  %v1943_v47 = vcombine.low %v566_v40, %v580_v14  ;;  %v589_v48 = vrot.slane %v588_v41, 4  ;;  %v1986_v61 = vld [vmem:[%s2478_s9 + $0x9c] sm:$0x1]  ;;  %v1021_v63 = vshll.u32 %v1983_v58, 16  ;;  %v1987_v2 = vld [vmem:[%s2478_s9 + $0xa0] sm:$0xf] }
  0x30   : > { %v1027_v0 = vshll.u32 %v1984_v59, 16  ;;  %v1032_v1 = vshrl.u32 %v1985_v60, 16  ;;  %v2290_v3 = vld [vmem:[%s2478_s9 + $0xe8] ss:$8 sps:$4 sm:$0xff]   ;;  %v1035_v4 = vshll.u32 %v1985_v60, 16  ;;  %v1041_v5 = vshll.u32 %v1986_v61, 16 }
  0x31   : > { %v603_v50 = vrot.slane %v602_v45, 4  ;;  %2145 = vmatprep.mubr.msk.bf16.mxu0 %vm235_vm1, %v1943_v47  ;;  %v594_v52 = vsel %vm2520_vm4, %v589_v48, %v593_v42  ;;  %v1988_v6 = vld [vmem:[%s2478_s9 + $0xa4] sm:$0x1]  ;;  %v1989_v7 = vld [vmem:[%s2478_s9 + $0xa8] sm:$0xf]  ;;  %v1020_v9 = vrot.slane %v1018_v62, 4 }
  0x32   : > { %v2293_v8 = vld [vmem:[%s2478_s9 + $0xf8] ss:$8 sps:$4 sm:$0xff]   ;;  %v1023_v10 = vrot.slane %v1021_v63, 5  ;;  %v1029_v11 = vrot.slane %v1027_v0, 5  ;;  %v1034_v12 = vrot.slane %v1032_v1, 4  ;;  %v1037_v15 = vrot.slane %v1035_v4, 5 }
  0x33   : > { %v608_v54 = vsel %vm2520_vm4, %v603_v50, %v607_v46  ;;  %v1990_v13 = vld [vmem:[%s2478_s9 + $0xac] sm:$0x1]  ;;  %v1043_v16 = vrot.slane %v1041_v5, 5  ;;  %v1046_v17 = vshrl.u32 %v1987_v2, 16  ;;  %v1049_v18 = vshll.u32 %v1987_v2, 16 }
  0x34   : > { %2152 = vmatmul.mubr.msk.bf16.vlgmr.msra.gmra.mxu1 %vm235_vm1, %v2288_v44  ;;  %v1944_v55 = vcombine.low %v594_v52, %v608_v54  ;;  %v1024_v19 = vor.u32 %v1023_v10, %v1020_v9  ;;  %v1055_v20 = vshll.u32 %v1988_v6, 16  ;;  %v1060_v21 = vshrl.u32 %v1989_v7, 16  ;;  %v2594_v27 = vld [vmem:[%s2773_s1 + $0x10] sm:$0x3]  ;;  %v1992_v40 = vld [vmem:[%s2478_s9 + $0xb4] sm:$0x1] }
  0x35   : > { %2170 = vmatpush3.bf16.msra.mxu1 %v1156_v49  ;;  %2155 = vmatprep.mubr.msk.bf16.mxu1 %vm235_vm1, %v2291_v53  ;;  %v1063_v22 = vshll.u32 %v1989_v7, 16  ;;  %v1038_v23 = vor.u32 %v1037_v15, %v1034_v12  ;;  %v1048_v24 = vrot.slane %v1046_v17, 4  ;;  %v1051_v25 = vrot.slane %v1049_v18, 5  ;;  %v1991_v39 = vld [vmem:[%s2478_s9 + $0xb0] sm:$0xf] }
  0x36   : > { %2219 = vmatprep.subr.msk.bf16.mxu1 %vm248_vm0, %v2033_v51  ;;  %2146 = vmatmul.mubr.msk.bf16.gmra.mxu0 %vm235_vm1, %v1944_v55  ;;  %v1069_v26 = vshll.u32 %v1990_v13, 16  ;;  %v1025_v28 = vrot.slane %v1024_v19, 4  ;;  %v1062_v29 = vrot.slane %v1060_v21, 4  ;;  %v1431_v31 = vsel %vm248_vm0, %v2033_v51, 0  ;;  %v1993_v41 = vld [vmem:[%s2478_s9 + $0xb8] sm:$0xf] }
  0x37   : > { %2161 = vmatprep.mubr.msk.bf16.mxu0 %vm235_vm1, %v2289_v38  ;;  %v1065_v30 = vrot.slane %v1063_v22, 5  ;;  %v1039_v32 = vrot.slane %v1038_v23, 4  ;;  %v1052_v33 = vor.u32 %v1051_v25, %v1048_v24  ;;  %v1057_v34 = vrot.slane %v1055_v20, 5  ;;  %v2294_v42 = vld [vmem:[%s2478_s9 + $0x108] ss:$8 sps:$4 sm:$0xff]  }
  0x38   : > { %v1071_v35 = vrot.slane %v1069_v26, 5  ;;  %v1030_v36 = vsel %vm2520_vm4, %v1025_v28, %v1029_v11  ;;  %v1994_v45 = vld [vmem:[%s2478_s9 + $0xbc] sm:$0x1]  ;;  %v1074_v46 = vshrl.u32 %v1991_v39, 16  ;;  %v1077_v47 = vshll.u32 %v1991_v39, 16 }
  0x39   : > { %v1066_v37 = vor.u32 %v1065_v30, %v1062_v29  ;;  %v1044_v44 = vsel %vm2520_vm4, %v1039_v32, %v1043_v16  ;;  %v1053_v14 = vrot.slane %v1052_v33, 4  ;;  %v2295_v50 = vld [vmem:[%s2478_s9 + $0x8] ss:$8 sps:$4 sm:$0xff]   ;;  %v1083_v51 = vshll.u32 %v1992_v40, 16  ;;  %v1995_v53 = vld [vmem:[%s2478_s9 + $0xc0] sm:$0xf] }
  0x3a   : > { %v2000_v48 = vcombine.low %v1030_v36, %v1044_v44  ;;  %v1088_v52 = vshrl.u32 %v1993_v41, 16  ;;  %v1076_v38 = vrot.slane %v1074_v46, 4  ;;  %v1079_v55 = vrot.slane %v1077_v47, 5  ;;  %v1997_v62 = vld [vmem:[%s2478_s9 + $0xc8] sm:$0xf] }
  0x3b   : > { %v1067_v49 = vrot.slane %v1066_v37, 4  ;;  %v1058_v54 = vsel %vm2520_vm4, %v1053_v14, %v1057_v34  ;;  %v1085_v59 = vrot.slane %v1083_v51, 5  ;;  %v1097_v61 = vshll.u32 %v1994_v45, 16  ;;  %v1998_v2 = vld [vmem:[%s2478_s9 + $0xcc] sm:$0x1] }
  0x3c   : > { %2156 = vmatmul.mubr.msk.bf16.gmra.mxu1 %vm235_vm1, %v2292_v57  ;;  %v1996_v57 = vld [vmem:[%s2478_s9 + $0xc4] sm:$0x1]  ;;  %v1090_v60 = vrot.slane %v1088_v52, 4  ;;  %v1080_v0 = vor.u32 %v1079_v55, %v1076_v38  ;;  %v1105_v5 = vshll.u32 %v1995_v53, 16  ;;  %v1116_v7 = vshrl.u32 %v1997_v62, 16 }
  0x3d   : > { %2171 = vmatprep.mubr.msk.bf16.mxu1 %vm235_vm1, %v2000_v48  ;;  %v1072_v58 = vsel %vm2520_vm4, %v1067_v49, %v1071_v35  ;;  %v1099_v4 = vrot.slane %v1097_v61, 5  ;;  %v1111_v6 = vshll.u32 %v1996_v57, 16  ;;  %v1119_v11 = vshll.u32 %v1997_v62, 16  ;;  %v2296_v16 = vld [vmem:[%s2478_s9 + $0x18] ss:$8 sps:$4 sm:$0xff]  }
  0x3e   : > { %2162 = vmatmul.mubr.msk.bf16.vlgmr.msra.gmra.mxu0 %vm235_vm1, %v2290_v3  ;;  %v2001_v63 = vcombine.low %v1058_v54, %v1072_v58  ;;  %v1102_v3 = vshrl.u32 %v1995_v53, 16  ;;  %v1107_v12 = vrot.slane %v1105_v5, 5  ;;  %v1118_v13 = vrot.slane %v1116_v7, 4  ;;  %v2297_v29 = vld [vmem:[%s2478_s9 + $0x28] ss:$8 sps:$4 sm:$0xff]  }
  0x3f   : > { %2180 = vmatpush3.bf16.msra.mxu0 %v1294_v56  ;;  %2165 = vmatprep.mubr.msk.bf16.mxu0 %vm235_vm1, %v2293_v8  ;;  %v1091_v56 = vshll.u32 %v1993_v41, 16  ;;  %v1081_v8 = vrot.slane %v1080_v0, 4  ;;  %v1125_v15 = vshll.u32 %v1998_v2, 16  ;;  %v1121_v19 = vrot.slane %v1119_v11, 5  ;;  %v2042_v30 = vld [vmem:[%s2478_s9 + $0x8] sm:$0xf] }
  0x40   : > { %2220 = vmatprep.subr.msk.bf16.mxu0 %vm248_vm0, %v2594_v27  ;;  %v1104_v10 = vrot.slane %v1102_v3, 4  ;;  %v1113_v21 = vrot.slane %v1111_v6, 5  ;;  %v1677_v25 = vsel %vm248_vm0, %v2594_v27, 0  ;;  %v2299_v32 = vld [vmem:[%s2478_s9 + $0x50] ss:$8 sps:$4 sm:$0xff]   ;;  %v1539_v35 = vshrl.u32 %v2042_v30, 16 }
  0x41   : > { %v1093_v1 = vrot.slane %v1091_v56, 5  ;;  %v1086_v17 = vsel %vm2520_vm4, %v1081_v8, %v1085_v59  ;;  %v1122_v23 = vor.u32 %v1121_v19, %v1118_v13  ;;  %v1127_v24 = vrot.slane %v1125_v15, 5  ;;  %v2043_v33 = vld [vmem:[%s2478_s9 + $0xc] sm:$0x1]  ;;  %v2044_v34 = vld [vmem:[%s2478_s9 + $0x10] sm:$0xf] }
  0x42   : > { %v1108_v20 = vor.u32 %v1107_v12, %v1104_v10  ;;  %v2045_v37 = vld [vmem:[%s2478_s9 + $0x14] sm:$0x1]  ;;  %v1542_v39 = vshll.u32 %v2042_v30, 16  ;;  %v1548_v27 = vshll.u32 %v2043_v33, 16  ;;  %v1553_v40 = vshrl.u32 %v2044_v34, 16 }
  0x43   : > { %v1094_v9 = vor.u32 %v1093_v1, %v1090_v60  ;;  %v1556_v44 = vshll.u32 %v2044_v34, 16  ;;  %v1562_v14 = vshll.u32 %v2045_v37, 16  ;;  %v2046_v45 = vld [vmem:[%s2478_s9 + $0x18] sm:$0xf]  ;;  %v2048_v54 = vld [vmem:[%s2478_s9 + $0x20] sm:$0xf] }
  0x44   : > { %2172 = vmatmul.mubr.msk.bf16.vlgmr.msra.gmra.mxu1 %vm235_vm1, %v2001_v63  ;;  %v1109_v28 = vrot.slane %v1108_v20, 4  ;;  %v1544_v47 = vrot.slane %v1542_v39, 5  ;;  %v1550_v48 = vrot.slane %v1548_v27, 5  ;;  %v1555_v49 = vrot.slane %v1553_v40, 4  ;;  %v2298_v51 = vld [vmem:[%s2478_s9 + $0x38] ss:$8 sps:$4 sm:$0xff]  }
  0x45   : > { %2190 = vmatpush3.bf16.msra.mxu1 %v1431_v31  ;;  %v1095_v18 = vrot.slane %v1094_v9, 4  ;;  %v1123_v31 = vrot.slane %v1122_v23, 4  ;;  %v1558_v52 = vrot.slane %v1556_v44, 5  ;;  %v1564_v53 = vrot.slane %v1562_v14, 5  ;;  %v2049_v38 = vld [vmem:[%s2478_s9 + $0x24] sm:$0x1] }
  0x46   : > { %2166 = vmatmul.mubr.msk.bf16.gmra.mxu0 %vm235_vm1, %v2294_v42  ;;  %v1114_v36 = vsel %vm2520_vm4, %v1109_v28, %v1113_v21  ;;  %v1541_v42 = vrot.slane %v1539_v35, 4  ;;  %v1567_v56 = vshrl.u32 %v2046_v45, 16  ;;  %v1570_v57 = vshll.u32 %v2046_v45, 16  ;;  %v2300_v63 = vld [vmem:[%s2478_s9 + $0x60] ss:$8 sps:$4 sm:$0xff]  }
  0x47   : > { %2181 = vmatprep.mubr.msk.bf16.mxu0 %vm235_vm1, %v2295_v50  ;;  %v1100_v22 = vsel %vm2520_vm4, %v1095_v18, %v1099_v4  ;;  %v1128_v41 = vsel %vm2520_vm4, %v1123_v31, %v1127_v24  ;;  %v2047_v50 = vld [vmem:[%s2478_s9 + $0x1c] sm:$0x1]  ;;  %v1559_v59 = vor.u32 %v1558_v52, %v1555_v49  ;;  %v1581_v60 = vshrl.u32 %v2048_v54, 16  ;;  %v2301_v6 = vld [vmem:[%s2478_s9 + $0x70] ss:$8 sps:$4 sm:$0xff]  }
  0x48   : > { %v2002_v26 = vcombine.low %v1086_v17, %v1100_v22  ;;  %v2003_v46 = vcombine.low %v1114_v36, %v1128_v41  ;;  %v1545_v55 = vor.u32 %v1544_v47, %v1541_v42  ;;  %v1576_v58 = vshll.u32 %v2047_v50, 16  ;;  %v2050_v11 = vld [vmem:[%s2478_s9 + $0x28] sm:$0xf]  ;;  %v2051_v15 = vld [vmem:[%s2478_s9 + $0x2c] sm:$0x1] }
  0x49   : > { %v1584_v61 = vshll.u32 %v2048_v54, 16  ;;  %v1590_v62 = vshll.u32 %v2049_v38, 16  ;;  %v1569_v1 = vrot.slane %v1567_v56, 4  ;;  %v1572_v2 = vrot.slane %v1570_v57, 5  ;;  %v2053_v17 = vld [vmem:[%s2478_s9 + $0x34] sm:$0x1] }
  0x4a   : > { %2175 = vmatprep.mubr.msk.bf16.mxu1 %vm235_vm1, %v2002_v26  ;;  %v1546_v0 = vrot.slane %v1545_v55, 4  ;;  %v1560_v3 = vrot.slane %v1559_v59, 4  ;;  %v1583_v4 = vrot.slane %v1581_v60, 4  ;;  %v1578_v9 = vrot.slane %v1576_v58, 5  ;;  %v2054_v22 = vld [vmem:[%s2478_s9 + $0x38] sm:$0xf] }
  0x4b   : > { %v1586_v5 = vrot.slane %v1584_v61, 5  ;;  %v1573_v8 = vor.u32 %v1572_v2, %v1569_v1  ;;  %v1592_v10 = vrot.slane %v1590_v62, 5  ;;  %v1595_v20 = vshrl.u32 %v2050_v11, 16  ;;  %v2055_v28 = vld [vmem:[%s2478_s9 + $0x3c] sm:$0x1] }
  0x4c   : > { %2176 = vmatmul.mubr.msk.bf16.gmra.mxu1 %vm235_vm1, %v2003_v46  ;;  %v1551_v7 = vsel %vm2520_vm4, %v1546_v0, %v1550_v48  ;;  %v1565_v12 = vsel %vm2520_vm4, %v1560_v3, %v1564_v53  ;;  %v1598_v21 = vshll.u32 %v2050_v11, 16  ;;  %v1604_v24 = vshll.u32 %v2051_v15, 16  ;;  %v2056_v33 = vld [vmem:[%s2478_s9 + $0x40] sm:$0xf]  ;;  %v2057_v39 = vld [vmem:[%s2478_s9 + $0x44] sm:$0x1] }
  0x4d   : > { %2191 = vmatprep.mubr.msk.bf16.mxu1 %vm235_vm1, %v2299_v32  ;;  %v1587_v13 = vor.u32 %v1586_v5, %v1583_v4  ;;  %v2059_v18 = vcombine.low %v1551_v7, %v1565_v12  ;;  %v1574_v19 = vrot.slane %v1573_v8, 4  ;;  %v1597_v30 = vrot.slane %v1595_v20, 4  ;;  %v2302_v47 = vld [vmem:[%s2478_s9 + $0x80] ss:$8 sps:$4 sm:$0xff]  }
  0x4e   : > { %2182 = vmatmul.mubr.msk.bf16.vlgmr.msra.gmra.mxu0 %vm235_vm1, %v2296_v16  ;;  %v2052_v16 = vld [vmem:[%s2478_s9 + $0x30] sm:$0xf]  ;;  %v1600_v31 = vrot.slane %v1598_v21, 5  ;;  %v1618_v32 = vshll.u32 %v2053_v17, 16  ;;  %v1606_v35 = vrot.slane %v1604_v24, 5  ;;  %v1623_v42 = vshrl.u32 %v2054_v22, 16 }
  0x4f   : > { %2200 = vmatpush3.bf16.msra.mxu0 %v1677_v25  ;;  %2185 = vmatprep.mubr.msk.bf16.mxu0 %vm235_vm1, %v2297_v29  ;;  %v1588_v23 = vrot.slane %v1587_v13, 4  ;;  %v1609_v25 = vshrl.u32 %v2052_v16, 16  ;;  %v1612_v26 = vshll.u32 %v2052_v16, 16  ;;  %v1579_v29 = vsel %vm2520_vm4, %v1574_v19, %v1578_v9  ;;  %s2706_s9 = scalar_lea.vmem [#allocation3], %s1913_s8 }
  0x50   : > { %v1601_v40 = vor.u32 %v1600_v31, %v1597_v30  ;;  %v1620_v41 = vrot.slane %v1618_v32, 5  ;;  %v1626_v14 = vshll.u32 %v2054_v22, 16  ;;  %v1632_v45 = vshll.u32 %v2055_v28, 16  ;;  %s1814_s11 = sshll.u32 %s2706_s9, 4  ;;  %s2721_s11 = int_to_ptr.vmem [resolvable:$true] %s1814_s11 }
  0x51   : > { %v1593_v34 = vsel %vm2520_vm4, %v1588_v23, %v1592_v10  ;;  %v1611_v36 = vrot.slane %v1609_v25, 4  ;;  %v1614_v37 = vrot.slane %v1612_v26, 5  ;;  %v1637_v46 = vshrl.u32 %v2056_v33, 16  ;;  %s2303_s15 = scalar_lea.vmem %s2721_s11, 1024  ;;  %p2310_p1 = scmp.lt.s32.totalorder %s2721_s11, %s2308_s27 }
  0x52   : > { %v2060_v27 = vcombine.low %v1579_v29, %v1593_v34  ;;  %v1602_v48 = vrot.slane %v1601_v40, 4  ;;  %v1625_v49 = vrot.slane %v1623_v42, 4  ;;  %v1640_v50 = vshll.u32 %v2056_v33, 16  ;;  %p2304_p12 = scmp.ne.s32.totalorder %s2721_s11, %s2303_s15  ;;  %p2311_p2 = scmp.lt.s32.totalorder %s2309_s28, %s2303_s15 }
  0x53   : > { %v1615_v44 = vor.u32 %v1614_v37, %v1611_v36  ;;  %v1628_v53 = vrot.slane %v1626_v14, 5  ;;  %v1639_v54 = vrot.slane %v1637_v46, 4  ;;  %v1634_v58 = vrot.slane %v1632_v45, 5 }
  0x54   : > { %2192 = vmatmul.mubr.msk.bf16.vlgmr.msra.gmra.mxu1 %vm235_vm1, %v2300_v63  ;;  %v1607_v38 = vsel %vm2520_vm4, %v1602_v48, %v1606_v35  ;;  %v1642_v55 = vrot.slane %v1640_v50, 5  ;;  %p2305_p13 = pnand %p2304_p12, %p2444_p4  ;;  %p2312_p3 = por %p2311_p2, %p2310_p1 }
  0x55   : > { %2195 = vmatprep.mubr.msk.bf16.mxu1 %vm235_vm1, %v2301_v6  ;;  %v1616_v52 = vrot.slane %v1615_v44, 4  ;;  %v1629_v57 = vor.u32 %v1628_v53, %v1625_v49 }
  0x56   : > { %2186 = vmatmul.mubr.msk.bf16.gmra.mxu0 %vm235_vm1, %v2298_v51  ;;  %v1646_v51 = vshll.u32 %v2057_v39, 16  ;;  %v1643_v60 = vor.u32 %v1642_v55, %v1639_v54  ;;  %p2306_p0 = pneg %p2305_p13 }
  0x57   : > { %2201 = vmatprep.mubr.msk.bf16.mxu0 %vm235_vm1, %v2059_v18  ;;  %v1621_v56 = vsel %vm2520_vm4, %v1616_v52, %v1620_v41  ;;  %v1630_v62 = vrot.slane %v1629_v57, 4 }
  0x58   : > { %v2061_v59 = vcombine.low %v1607_v38, %v1621_v56  ;;  %v1648_v61 = vrot.slane %v1646_v51, 5  ;;  %v1644_v63 = vrot.slane %v1643_v60, 4  ;;  %p2313_p5 = pnand %p2312_p3, %p2306_p0 }
  0x59   : > { %v1635_v0 = vsel %vm2520_vm4, %v1630_v62, %v1634_v58 }
  0x5a   : > { %v1649_v1 = vsel %vm2520_vm4, %v1644_v63, %v1648_v61 }
  0x5b   : > { %v2062_v2 = vcombine.low %v1635_v0, %v1649_v1 }
  0x5c   : > { %2196 = vmatmul.mubr.msk.bf16.gmra.mxu1 %vm235_vm1, %v2302_v47 }
  0x5e   : > { %2202 = vmatmul.mubr.msk.bf16.vlgmr.msra.gmra.mxu0 %vm235_vm1, %v2060_v27 }
  0x5f   : > { %2205 = vmatprep.mubr.msk.bf16.mxu0 %vm235_vm1, %v2061_v59 }
  0x66   : > { %2206 = vmatmul.mubr.msk.bf16.gmra.mxu0 %vm235_vm1, %v2062_v2 }
  0xdb   : > { %v2123_v5 = vpop.f32.mrf.mxu0 }
  0xdc   : > { %v2127_v3 = vpop.f32.mrf.mxu1 }
  0xdd   : > { %v286_v8 = vpop.f32.mrf.mxu0 }
  0xde   : > { %v302_v4 = vpop.f32.mrf.mxu1 }
  0xdf   : > { %v2124_v11 = vpop.f32.mrf.mxu0 }
  0xe0   : > { %v2685_v6 = vpop.f32.mrf.mxu1 }
  0xe1   : > { %v289_v15 = vpop.f32.mrf.mxu0 }
  0xe2   : > { %v2687_v7 = vpop.f32.mrf.mxu1 }
  0xe4   : > { %v2133_v9 = vpop.f32.mrf.mxu1 }
  0xe5   : > { %v456_v14 = vadd.f32 %v2133_v9, %v2123_v5 }
  0xe6   : > { %v423_v10 = vpop.f32.mrf.mxu1 }
  0xe7   : > { %v454_v47 = vadd.f32 %v423_v10, %v286_v8 }
  0xe8   : > { %v2134_v12 = vpop.f32.mrf.mxu1 }
  0xe9   : > { %v457_v50 = vadd.f32 %v2134_v12, %v2124_v11 }
  0xea   : > { %v426_v13 = vpop.f32.mrf.mxu1 }
  0xeb   : > { %v2143_v43 = vpop.f32.mrf.mxu0  ;;  %v455_v54 = vadd.f32 %v426_v13, %v289_v15 }
  0xec   : > { %v2137_v16 = vpop.f32.mrf.mxu1  ;;  %v705_v49 = vadd.f32 %v2143_v43, %v456_v14 }
  0xed   : > { %v672_v18 = vpop.f32.mrf.mxu0  ;;  %v460_v61 = vadd.f32 %v2137_v16, %v2127_v3 }
  0xee   : > { %v439_v17 = vpop.f32.mrf.mxu1  ;;  %v703_v53 = vadd.f32 %v672_v18, %v454_v47 }
  0xef   : > { %v2144_v20 = vpop.f32.mrf.mxu0  ;;  %v458_v1 = vadd.f32 %v439_v17, %v302_v4 }
  0xf0   : > { %v2138_v19 = vpop.f32.mrf.mxu1  ;;  %v706_v56 = vadd.f32 %v2144_v20, %v457_v50 }
  0xf1   : > { %v675_v22 = vpop.f32.mrf.mxu0  ;;  %v461_v11 = vadd.f32 %v2138_v19, %v2685_v6 }
  0xf2   : > { %v442_v21 = vpop.f32.mrf.mxu1  ;;  %v704_v60 = vadd.f32 %v675_v22, %v455_v54 }
  0xf3   : > { %v459_v22 = vadd.f32 %v442_v21, %v2687_v7 }
  0xf4   : > { %v2153_v23 = vpop.f32.mrf.mxu1 }
  0xf5   : > { %v842_v38 = vadd.f32 %v2153_v23, %v705_v49 }
  0xf6   : > { %v809_v24 = vpop.f32.mrf.mxu1  ;;  %v2147_v25 = vpop.f32.mrf.mxu0 }
  0xf7   : > { %v840_v57 = vadd.f32 %v809_v24, %v703_v53  ;;  %v709_v13 = vadd.f32 %v2147_v25, %v460_v61 }
  0xf8   : > { %v2154_v26 = vpop.f32.mrf.mxu1  ;;  %v688_v28 = vpop.f32.mrf.mxu0 }
  0xf9   : > { %v843_v63 = vadd.f32 %v2154_v26, %v706_v56  ;;  %v707_v20 = vadd.f32 %v688_v28, %v458_v1 }
  0xfa   : > { %v812_v29 = vpop.f32.mrf.mxu1  ;;  %v2148_v30 = vpop.f32.mrf.mxu0 }
  0xfb   : > { %v841_v8 = vadd.f32 %v812_v29, %v704_v60  ;;  %v710_v26 = vadd.f32 %v2148_v30, %v461_v11  ;;  %v2067_v30 = vld [vmem:[%s2774_s2] ss:$0 sm:$0xff] }
  0xfc   : > { %v2157_v31 = vpop.f32.mrf.mxu1  ;;  %v691_v32 = vpop.f32.mrf.mxu0 }
  0xfd   : > { %v846_v23 = vadd.f32 %v2157_v31, %v709_v13 }
  0xfe   : > { %v825_v33 = vpop.f32.mrf.mxu1  ;;  %v2163_v34 = vpop.f32.mrf.mxu0 }
  0xff   : > { %v979_v62 = vadd.f32 %v2163_v34, %v842_v38  ;;  %v844_v29 = vadd.f32 %v825_v33, %v707_v20 }
 0x100   : > { %v2158_v35 = vpop.f32.mrf.mxu1  ;;  %v946_v36 = vpop.f32.mrf.mxu0 }
 0x101   : > { %v977_v5 = vadd.f32 %v946_v36, %v840_v57 }
 0x102   : > { %v2164_v37 = vpop.f32.mrf.mxu0  ;;  %v2689_v39 = vpop.f32.mrf.mxu1 }
 0x103   : > { %v980_v15 = vadd.f32 %v2164_v37, %v843_v63  ;;  %v708_v37 = vadd.f32 %v691_v32, %v459_v22 }
 0x104   : > { %v949_v27 = vpop.f32.mrf.mxu0  ;;  %v2173_v41 = vpop.f32.mrf.mxu1 }
 0x105   : > { %v1225_v9 = vadd.f32 %v2173_v41, %v979_v62  ;;  %v978_v16 = vadd.f32 %v949_v27, %v841_v8  ;;  %v847_v41 = vadd.f32 %v2158_v35, %v710_v26  ;;  %v845_v14 = vadd.f32 %v2689_v39, %v708_v37 }
 0x106   : > { %v2167_v40 = vpop.f32.mrf.mxu0  ;;  %v1192_v44 = vpop.f32.mrf.mxu1 }
 0x107   : > { %v1223_v43 = vadd.f32 %v1192_v44, %v977_v5  ;;  %v983_v7 = vadd.f32 %v2167_v40, %v846_v23 }
 0x108   : > { %v962_v42 = vpop.f32.mrf.mxu0  ;;  %v2174_v46 = vpop.f32.mrf.mxu1 }
 0x109   : > { %v1226_v17 = vadd.f32 %v2174_v46, %v980_v15  ;;  %v981_v31 = vadd.f32 %v962_v42, %v844_v29 }
 0x10a   : > { %v2691_v45 = vpop.f32.mrf.mxu0  ;;  %v1195_v51 = vpop.f32.mrf.mxu1 }
 0x10b   : > { %v1224_v6 = vadd.f32 %v1195_v51, %v978_v16  ;;  %v984_v40 = vadd.f32 %v2691_v45, %v847_v41 }
 0x10c   : > { %v2693_v48 = vpop.f32.mrf.mxu0  ;;  %v2177_v58 = vpop.f32.mrf.mxu1 }
 0x10d   : > { %v1229_v47 = vadd.f32 %v2177_v58, %v983_v7  ;;  %v982_v54 = vadd.f32 %v2693_v48, %v845_v14 }
 0x10e   : > { %v2183_v52 = vpop.f32.mrf.mxu0  ;;  %v1208_v0 = vpop.f32.mrf.mxu1 }
 0x10f   : > { %v1363_v4 = vadd.f32 %v2183_v52, %v1225_v9  ;;  %v1227_v50 = vadd.f32 %v1208_v0, %v981_v31 }
 0x110   : > { %v1330_v55 = vpop.f32.mrf.mxu0  ;;  %v2178_v10 = vpop.f32.mrf.mxu1 }
 0x111   : > { %v1361_v36 = vadd.f32 %v1330_v55, %v1223_v43  ;;  %v1230_v38 = vadd.f32 %v2178_v10, %v984_v40 }
 0x112   : > { %v2184_v59 = vpop.f32.mrf.mxu0  ;;  %v1211_v18 = vpop.f32.mrf.mxu1 }
 0x113   : > { %v1364_v21 = vadd.f32 %v2184_v59, %v1226_v17  ;;  %v1228_v62 = vadd.f32 %v1211_v18, %v982_v54 }
 0x114   : > { %v1333_v2 = vpop.f32.mrf.mxu0  ;;  %v2193_v24 = vpop.f32.mrf.mxu1 }
 0x115   : > { %v1500_v19 = vadd.f32 %v2193_v24, %v1363_v4  ;;  %v1362_v33 = vadd.f32 %v1333_v2, %v1224_v6 }
 0x116   : > { %v2187_v12 = vpop.f32.mrf.mxu0  ;;  %v1467_v25 = vpop.f32.mrf.mxu1 }
 0x117   : > { %v1498_v44 = vadd.f32 %v1467_v25, %v1361_v36  ;;  %v1367_v56 = vadd.f32 %v2187_v12, %v1229_v47 }
 0x118   : > { %v1346_v3 = vpop.f32.mrf.mxu0  ;;  %v2194_v27 = vpop.f32.mrf.mxu1 }
 0x119   : > { %v1501_v35 = vadd.f32 %v2194_v27, %v1364_v21  ;;  %v1365_v61 = vadd.f32 %v1346_v3, %v1227_v50 }
 0x11a   : > { %v2188_v34 = vpop.f32.mrf.mxu0  ;;  %v1470_v49 = vpop.f32.mrf.mxu1 }
 0x11b   : > { %v1499_v53 = vadd.f32 %v1470_v49, %v1362_v33  ;;  %v1368_v5 = vadd.f32 %v2188_v34, %v1230_v38 }
 0x11c   : > { %v1349_v28 = vpop.f32.mrf.mxu0  ;;  %v2197_v39 = vpop.f32.mrf.mxu1 }
 0x11d   : > { %v1504_v48 = vadd.f32 %v2197_v39, %v1367_v56  ;;  %v1366_v13 = vadd.f32 %v1349_v28, %v1228_v62 }
 0x11e   : > { %v2203_v46 = vpop.f32.mrf.mxu0  ;;  %v1483_v60 = vpop.f32.mrf.mxu1 }
 0x11f   : > { %v1746_v32 = vadd.f32 %v2203_v46, %v1500_v19  ;;  %v1502_v10 = vadd.f32 %v1483_v60, %v1365_v61 }
 0x120   : > { %v1713_v51 = vpop.f32.mrf.mxu0  ;;  %v2198_v2 = vpop.f32.mrf.mxu1 }
 0x121   : > { %v1777_v52 = vadd.f32 %v2067_v30, %v1746_v32  ;;  %v1744_v42 = vadd.f32 %v1713_v51, %v1498_v44  ;;  %v1505_v18 = vadd.f32 %v2198_v2, %v1368_v5 }
 0x122   : > { %v2204_v55 = vpop.f32.mrf.mxu0  ;;  %v1486_v12 = vpop.f32.mrf.mxu1 }
 0x123   : > { %v1785_v57 = vmax.f32 %v1777_v52, 0.0  ;;  %v1775_v58 = vadd.f32 %v2067_v30, %v1744_v42  ;;  %v1747_v59 = vadd.f32 %v2204_v55, %v1501_v35  ;;  %v1503_v16 = vadd.f32 %v1486_v12, %v1366_v13 }
 0x124   : > { %v1716_v63 = vpop.f32.mrf.mxu0 }
 0x125   : > { %1793 = vst [vmem:[%s2706_s9 + $0x10] sm:$0xff] %v1785_v57  ;;  %v1783_v45 = vmax.f32 %v1775_v58, 0.0  ;;  %v1778_v0 = vadd.f32 %v2067_v30, %v1747_v59  ;;  %v1745_v1 = vadd.f32 %v1716_v63, %v1499_v53 }
 0x126   : > { %v2207_v11 = vpop.f32.mrf.mxu0 }
 0x127   : > { %1791 = vst [vmem:[%s2706_s9] sm:$0xff] %v1783_v45  ;;  %v1786_v8 = vmax.f32 %v1778_v0, 0.0  ;;  %v1776_v9 = vadd.f32 %v2067_v30, %v1745_v1  ;;  %v1750_v43 = vadd.f32 %v2207_v11, %v1504_v48 }
 0x128   : > { %v1729_v20 = vpop.f32.mrf.mxu0 }
 0x129   : > { %1794 = vst [vmem:[%s2706_s9 + $0x18] sm:$0xff] %v1786_v8  ;;  %v1784_v15 = vmax.f32 %v1776_v9, 0.0  ;;  %v1781_v22 = vadd.f32 %v2067_v30, %v1750_v43  ;;  %v1748_v3 = vadd.f32 %v1729_v20, %v1502_v10 }
 0x12a   : > { %v2208_v23 = vpop.f32.mrf.mxu0 }
 0x12b   : > { %1792 = vst [vmem:[%s2706_s9 + $0x8] sm:$0xff] %v1784_v15  ;;  %v1789_v4 = vmax.f32 %v1781_v22, 0.0  ;;  %v1779_v17 = vadd.f32 %v2067_v30, %v1748_v3  ;;  %v1751_v24 = vadd.f32 %v2208_v23, %v1505_v18 }
 0x12c   : > { %v1732_v26 = vpop.f32.mrf.mxu0 }
 0x12d   : > { %1797 = vst [vmem:[%s2706_s9 + $0x30] sm:$0xff] %v1789_v4  ;;  %v1787_v29 = vmax.f32 %v1779_v17, 0.0  ;;  %v1782_v34 = vadd.f32 %v2067_v30, %v1751_v24  ;;  %v1749_v36 = vadd.f32 %v1732_v26, %v1503_v16 }
 0x12f   : > { %1795 = vst [vmem:[%s2706_s9 + $0x20] sm:$0xff] %v1787_v29  ;;  %v1790_v6 = vmax.f32 %v1782_v34, 0.0  ;;  %v1780_v19 = vadd.f32 %v2067_v30, %v1749_v36 }
 0x131   : > { %1798 = vst [vmem:[%s2706_s9 + $0x38] sm:$0xff] %v1790_v6  ;;  %v1788_v25 = vmax.f32 %v1780_v19, 0.0 }
 0x133   : > { %1796 = vst [vmem:[%s2706_s9 + $0x28] sm:$0xff] %v1788_v25 }
 0x134   : > { %2316 = shalt.err (!%p2313_p5)
}
 0x135   : > { %s2317_s29 = scalar_lea.hbm %s2719_s21, 1024  ;;  %s2321_s5 = scalar_lea.hbm %s2775_s3, 2048 }
 0x136   : > { %p2318_p6 = scmp.ne.s32.totalorder %s2719_s21, %s2317_s29  ;;  %p2322_p10 = scmp.lt.s32.totalorder %s2719_s21, %s2775_s3 }
 0x137   : > { %p2323_p11 = scmp.lt.s32.totalorder %s2321_s5, %s2317_s29 }
 0x138   : > { %p2319_p7 = pnand %p2318_p6, %p2444_p4 }
 0x139   : > { %p2324_p12 = por %p2323_p11, %p2322_p10 }
 0x13a   : > { %p2320_p9 = pneg %p2319_p7 }
 0x13c   : > { %p2325_p13 = pnand %p2324_p12, %p2320_p9 }
 0x13e   : > { %2328 = shalt.err (!%p2325_p13)
}
 0x13f   : > { %s2382_s8 = smov 128   ;;  %s2383_s9 = smov 8  }
 0x140   : > { %2222 = dma.vmem_to_hbm [thread:$0]  (%p2444_p4), %s2721_s11, 1024, %s2719_s21, %s2727_s23, %s2382_s8, %s2382_s8, %s2383_s9  }
 0x141 PF: > { %p2228_p0 = scmp.ge.s32.totalorder %s2379_s17, 2  ;;  %s1829_s10 = sand.u32 1, %s2359_s12  }
 0x142   : > { %s1830_s18 = scalar_lea.sflag [#allocation4], %s1829_s10 }
 0x143   : > { %p2225_p1 = pnand %p2228_p0, %p2451_p8 }
 0x145   : > { %p2226_p2 = pneg %p2225_p1 }
 0x147   : > { %2354 = dma.done.wait (%p2226_p2), %s1830_s18, 1024  }
 0x148   : > { %2356 = vsyncadd (%p2226_p2), %s1830_s18, 4294966272  ;;  %s16_s17 = sadd.s32 1, %s2379_s17   ;;  %s2780_s12 = smov %s2363_s13 }
 0x149   : > { %p13_p3 = scmp.ge.s32.totalorder %s16_s17, 4   ;;  %s2781_s13 = smov %s2367_s14 }
 0x14a   : > { %s2782_s14 = smov %s2457_s25  ;;  %s2783_s15 = smov %s2375_s16 }
 0x14b   : > { %s2784_s16 = smov %s2786_s20  ;;  %15 = sbr.rel (!%p13_p3) target bundleno = 4 (0x4), region = 81 }
 0x150   :  { %1835 = vsyncpa [#allocation4], 1 }
 0x151   :  { %1837 = vsyncpa [#allocation4 + $0x1], 1 }

</bundles_post_ra>
